<compile_context>
chip_gen: v5e
topology: v5e:2x2
jax: 0.10.0
libtpu: 0.0.40
codegen_flags: <defaults>
</compile_context>

<pallas_src>
import functools
import math

import jax
import jax.numpy as jnp
from jax.experimental import pallas as pl
from jax.experimental.pallas import tpu as pltpu

_MIB = 1024 * 1024


def _layernorm_kernel(x_ref, w_ref, b_ref, o_ref, *, eps):
    # x_ref: (TR, H) row tile; w_ref / b_ref: (1, H), resident across grid
    # steps (constant (0, 0) index_map => no re-DMA per step).
    x = x_ref[...].astype(jnp.float32)
    u = jnp.mean(x, axis=-1, keepdims=True)          # mean over hidden
    d = x - u                                        # x dies here -> one live f32 tile
    s = jnp.mean(d * d, axis=-1, keepdims=True)      # biased variance (two-pass, exact)
    # TF-style eps inside the sqrt; rsqrt lowers to the EUP (its own VLIW slot)
    # instead of burning VPU issue slots on a full-rate f32 divide.
    r = jax.lax.rsqrt(s + eps)
    w = w_ref[...].astype(jnp.float32)
    b = b_ref[...].astype(jnp.float32)
    # NOTE(v7x/bf16): if a bundle profile ever shows VALU co-binding with DMA,
    # the final affine could be done in bf16 (stats stay f32). Not enabled:
    # this kernel is HBM-bandwidth-bound on all current generations.
    o_ref[...] = (w * (d * r) + b).astype(o_ref.dtype)


def _tpu_generation():
    """Best-effort (device_kind, vmem_capacity_bytes) detection at trace time."""
    kind = ""
    try:
        kind = jax.devices()[0].device_kind.lower()
    except Exception:
        pass
    vmem = None
    try:
        vmem = int(pltpu.get_tpu_info().vmem_capacity_bytes)
    except Exception:
        vmem = None
    return kind, vmem


def _vmem_budget(kind, vmem_capacity):
    """Per-generation tile budget + explicit scoped-VMEM limit.

    The budget covers the double-buffered input + output tiles plus the f32
    temporaries the body keeps live; the limit additionally leaves room for
    compiler scratch and, on v7x, >=16 MiB headroom of the 64 MiB physical VMEM.
    """
    if "7" in kind:                       # v7x: ~3.2 TB/s HBM, 64 MiB VMEM per TC
        budget, limit = 20 * _MIB, 48 * _MIB
    elif "v6" in kind:                    # v6e: ~1.4 TB/s HBM, 128 MiB physical VMEM
        budget, limit = 14 * _MIB, 40 * _MIB
    elif "v5" in kind or "v4" in kind:    # v5e & older: ~0.8 TB/s, step overhead already small
        budget, limit = 10 * _MIB, 32 * _MIB
    else:                                 # unknown chip: conservative middle ground
        budget, limit = 12 * _MIB, 40 * _MIB
    if vmem_capacity:
        # Never plan more than ~1/3 of reported capacity for our tiles, and
        # never ask the compiler for more than ~3/4 of it.
        budget = min(budget, vmem_capacity // 3)
        limit = min(limit, (3 * vmem_capacity) // 4)
    return budget, limit


def _choose_tile_rows(rows, hidden, itemsize, budget_bytes):
    """Largest sublane-aligned, load-balanced row tile within the VMEM budget.

    LayerNorm is purely HBM-bandwidth-bound: big tiles amortize the ~0.35 us
    per-grid-step overhead. Per row we account for the double-buffered input
    and output tiles (2 + 2 buffers) plus the f32 temporaries the kernel body
    keeps live (one full tile for f32 inputs, two for narrower inputs that
    need an upcast copy).
    """
    align = max(8, 32 // itemsize)        # sublane packing: 8 f32, 16 bf16, 32 i8
    if rows <= align:
        return rows                       # single full-extent block (always legal)
    f32_temp_bytes = 4 if itemsize == 4 else 8
    bytes_per_row = hidden * (4 * itemsize + f32_temp_bytes)
    tr_max = max(budget_bytes // max(bytes_per_row, 1), align)
    tr_max = min(tr_max, rows)
    # Balance the grid so the ragged last block isn't nearly empty, then round
    # up to the sublane alignment (no hard row cap).
    n_tiles = pl.cdiv(rows, tr_max)
    tr = pl.cdiv(rows, n_tiles)
    tr = min(pl.cdiv(tr, align) * align, rows)
    return tr


def bert_layer_norm(x, weight, bias, eps=1e-12):
    orig_shape = x.shape
    hidden = orig_shape[-1]
    rows = math.prod(orig_shape[:-1]) if len(orig_shape) > 1 else 1
    x2 = x.reshape(rows, hidden)
    w2 = weight.reshape(1, hidden)
    b2 = bias.reshape(1, hidden)

    kind, vmem_capacity = _tpu_generation()
    budget, vmem_limit = _vmem_budget(kind, vmem_capacity)
    tr = _choose_tile_rows(rows, hidden, jnp.dtype(x.dtype).itemsize, budget)
    # cdiv grid: Pallas masks the ragged last block. Each output row depends
    # only on its own input row, so padded rows never touch valid outputs.
    grid = (pl.cdiv(rows, tr),)

    # Rows are independent. On multi-TensorCore chips (v7x) explicitly shard
    # the row axis across cores; plain "parallel" is the safe choice elsewhere.
    if "7" in kind:
        row_sem = getattr(pltpu, "CORE_PARALLEL", "parallel")
    else:
        row_sem = "parallel"

    # NOTE: for hidden < 128 (like the smoke test) lanes are partially masked;
    # real BERT hidden sizes (768/1024/...) are multiples of 128 and lane-dense.
    # pipeline_mode=pl.Buffered(3) on the input spec is deliberately NOT used:
    # only worth it if a profile shows exposed DMA start latency on v7x.
    kernel = functools.partial(_layernorm_kernel, eps=eps)
    out = pl.pallas_call(
        kernel,
        out_shape=jax.ShapeDtypeStruct((rows, hidden), x.dtype),
        grid_spec=pltpu.PrefetchScalarGridSpec(
            num_scalar_prefetch=0,
            grid=grid,
            in_specs=[
                pl.BlockSpec((tr, hidden), lambda i: (i, 0)),
                pl.BlockSpec((1, hidden), lambda i: (0, 0)),   # weight, resident
                pl.BlockSpec((1, hidden), lambda i: (0, 0)),   # bias, resident
            ],
            out_specs=pl.BlockSpec((tr, hidden), lambda i: (i, 0)),
        ),
        compiler_params=pltpu.CompilerParams(
            dimension_semantics=(row_sem,),
            # Explicit scoped-VMEM limit sized for the generation-aware tiles
            # plus headroom, so larger tiles never trip the default limit.
            vmem_limit_bytes=vmem_limit,
        ),
    )(x2, w2, b2)
    return out.reshape(orig_shape)


if __name__ == "__main__":
    key = jax.random.PRNGKey(0)
    batch, seq, hidden = 2, 8, 32
    x = jax.random.normal(key, (batch, seq, hidden), dtype=jnp.float32)

    # deterministic parameter init (matches nn.Parameter(ones/zeros))
    weight = jnp.ones((hidden,), dtype=jnp.float32)
    bias = jnp.zeros((hidden,), dtype=jnp.float32)

    y = bert_layer_norm(x, weight, bias, eps=1e-12)
    y = jax.block_until_ready(y)

    # reference check in plain JAX
    u = jnp.mean(x, axis=-1, keepdims=True)
    s = jnp.mean((x - u) ** 2, axis=-1, keepdims=True)
    ref = weight * ((x - u) / jnp.sqrt(s + 1e-12)) + bias
    assert jnp.allclose(y, ref, atol=1e-5, rtol=1e-5), "mismatch vs reference"

    print("KERNEL_OK")
</pallas_src>

<mosaic_0001>
module attributes {stable_mosaic.version = 11 : i64} {
  func.func @_layernorm_kernel(%arg0: i32, %arg1: memref<16x32xf32, #tpu.memory_space<vmem>>, %arg2: memref<1x32xf32, #tpu.memory_space<vmem>>, %arg3: memref<1x32xf32, #tpu.memory_space<vmem>>, %arg4: memref<16x32xf32, #tpu.memory_space<vmem>>) attributes {dimension_semantics = [#tpu.dimension_semantics<parallel>], iteration_bounds = array<i64: 1>, scalar_prefetch = 0 : i64, scratch_operands = 0 : i64, tpu.core_type = #tpu.core_type<tc>, window_params = [{transform_indices = @transform_0, window_bounds = array<i64: 16, 32>}, {pipeline_mode = #tpu.pipeline_mode<synchronous>, transform_indices = @transform_1, window_bounds = array<i64: 1, 32>}, {pipeline_mode = #tpu.pipeline_mode<synchronous>, transform_indices = @transform_2, window_bounds = array<i64: 1, 32>}, {transform_indices = @transform_3, window_bounds = array<i64: 16, 32>}]} {
    %c0 = arith.constant 0 : index
    %c0_0 = arith.constant 0 : index
    %0 = vector.load %arg1[%c0, %c0_0] : memref<16x32xf32, #tpu.memory_space<vmem>>, vector<16x32xf32>
    %cst = arith.constant dense<0.000000e+00> : vector<16xf32>
    %1 = vector.multi_reduction <add>, %0, %cst [1] : vector<16x32xf32> to vector<16xf32>
    %2 = vector.shape_cast %1 : vector<16xf32> to vector<16x1xf32>
    %cst_1 = arith.constant 3.200000e+01 : f32
    %3 = vector.broadcast %cst_1 : f32 to vector<16x1xf32>
    %4 = arith.divf %2, %3 : vector<16x1xf32>
    %5 = vector.broadcast %4 : vector<16x1xf32> to vector<16x32xf32>
    %6 = arith.subf %0, %5 : vector<16x32xf32>
    %7 = arith.mulf %6, %6 : vector<16x32xf32>
    %cst_2 = arith.constant dense<0.000000e+00> : vector<16xf32>
    %8 = vector.multi_reduction <add>, %7, %cst_2 [1] : vector<16x32xf32> to vector<16xf32>
    %9 = vector.shape_cast %8 : vector<16xf32> to vector<16x1xf32>
    %cst_3 = arith.constant 3.200000e+01 : f32
    %10 = vector.broadcast %cst_3 : f32 to vector<16x1xf32>
    %11 = arith.divf %9, %10 : vector<16x1xf32>
    %cst_4 = arith.constant 9.99999996E-13 : f32
    %12 = vector.broadcast %cst_4 : f32 to vector<16x1xf32>
    %13 = arith.addf %11, %12 : vector<16x1xf32>
    %14 = math.rsqrt %13 : vector<16x1xf32>
    %c0_5 = arith.constant 0 : index
    %c0_6 = arith.constant 0 : index
    %15 = vector.load %arg2[%c0_5, %c0_6] : memref<1x32xf32, #tpu.memory_space<vmem>>, vector<1x32xf32>
    %c0_7 = arith.constant 0 : index
    %c0_8 = arith.constant 0 : index
    %16 = vector.load %arg3[%c0_7, %c0_8] : memref<1x32xf32, #tpu.memory_space<vmem>>, vector<1x32xf32>
    %17 = vector.broadcast %14 : vector<16x1xf32> to vector<16x32xf32>
    %18 = arith.mulf %6, %17 : vector<16x32xf32>
    %19 = vector.broadcast %15 : vector<1x32xf32> to vector<16x32xf32>
    %20 = arith.mulf %19, %18 : vector<16x32xf32>
    %21 = vector.broadcast %16 : vector<1x32xf32> to vector<16x32xf32>
    %22 = arith.addf %20, %21 : vector<16x32xf32>
    %c0_9 = arith.constant 0 : index
    %c0_10 = arith.constant 0 : index
    %23 = vector.load %arg4[%c0_9, %c0_10] : memref<16x32xf32, #tpu.memory_space<vmem>>, vector<16x32xf32>
    tpu.vector_store %arg4[%c0_9, %c0_10], %22 {strides = array<i32>} : memref<16x32xf32, #tpu.memory_space<vmem>>, vector<16x32xf32>,
    return
  }
  func.func @transform_0(%arg0: i32) -> (i32, i32) {
    %c0_i32 = arith.constant 0 : i32
    %c0_i32_0 = arith.constant 0 : i32
    return %arg0, %c0_i32 : i32, i32
  }
  func.func @transform_1(%arg0: i32) -> (i32, i32) {
    %c0_i32 = arith.constant 0 : i32
    %c0_i32_0 = arith.constant 0 : i32
    %c0_i32_1 = arith.constant 0 : i32
    return %c0_i32, %c0_i32_0 : i32, i32
  }
  func.func @transform_2(%arg0: i32) -> (i32, i32) {
    %c0_i32 = arith.constant 0 : i32
    %c0_i32_0 = arith.constant 0 : i32
    %c0_i32_1 = arith.constant 0 : i32
    return %c0_i32, %c0_i32_0 : i32, i32
  }
  func.func @transform_3(%arg0: i32) -> (i32, i32) {
    %c0_i32 = arith.constant 0 : i32
    %c0_i32_0 = arith.constant 0 : i32
    return %arg0, %c0_i32 : i32, i32
  }
}

</mosaic_0001>

<bundles_post_ra>
// kernel: tpu_custom_call.1
= control target key start
LH: loop header
LB: loop body
LE: loop exit
PB: predicated region body
PF: predicated region fallthrough
CT: control target
= control target key end

     0   :  { %8 = vsyncpa [#allocation3], 0  ;;  %s275_s0 = inlined_call_operand.hbm [shape: f32[16,32], index: 0, kind: input, shape index: {}]   ;;  %s276_s1 = inlined_call_operand.hbm [shape: f32[1,32], index: 1, kind: input, shape index: {}]   ;;  %s277_s2 = inlined_call_operand.vmem [shape: f32[1,32], index: 2, kind: input, shape index: {}]   ;;  %s278_s3 = inlined_call_operand.hbm [shape: f32[16,32], index: 3, kind: output, shape index: {}]  }
   0x1   :  { %9 = vsyncpa [#allocation6], 0 }
   0x2   :  { %10 = vsyncpa [#allocation4], 0  ;;  %s15_s14 = sshll.u32 %s275_s0, 4  ;;  %s225_s15 = smov [#allocation2]   ;;  %s16_s14 = int_to_ptr.hbm [resolvable:$true] %s15_s14 }
   0x3   :  { %s17_s16 = sshll.u32 %s225_s15, 4  ;;  %s29_s19 = sshll.u32 %s276_s1, 4  ;;  %s18_s16 = int_to_ptr.vmem [resolvable:$true] %s17_s16  ;;  %s30_s19 = int_to_ptr.hbm [resolvable:$true] %s29_s19 }
   0x4   :  { %s226_s20 = smov 128   ;;  %s227_s21 = smov 8  }
   0x5   :  { %23 = dma.hbm_to_vmem [thread:$0]  %s16_s14, 256, %s18_s16, [#allocation3], %s226_s20, %s226_s20, %s227_s21  }
   0x6   :  { %s228_s22 = smov [#allocation5]  }
   0x7   :  { %s31_s23 = sshll.u32 %s228_s22, 4  ;;  %s32_s23 = int_to_ptr.vmem [resolvable:$true] %s31_s23 }
   0x8   :  { %34 = dma.hbm_to_vmem [thread:$0]  %s30_s19, 16, %s32_s23, [#allocation6]  }
   0x9   :  { %219 = dma.done.wait [#allocation3], 256  }
   0xa   :  { %220 = vsyncadd [#allocation3], 4294967040 }
   0xb   :  { %221 = dma.done.wait [#allocation6], 16  }
   0xc   :  { %222 = vsyncadd [#allocation6], 4294967280  ;;  %vm47_vm0 = vcmask 261120   ;;  %v45_v0 = vld [vmem:[#allocation2] sm:$0xff]  ;;  %v46_v2 = vld [vmem:[#allocation2 + $0x8] sm:$0xff]  ;;  %v229_v4 = vmov 32.0  }
   0xd   :  { %v48_v1 = vsel %vm47_vm0, %v45_v0, 0.0  ;;  %v51_v3 = vsel %vm47_vm0, %v46_v2, 0.0  ;;  %141 = vrcp.f32 %v229_v4  ;;  %v139_v35 = vld [vmem:[#allocation5] ss:$0 sm:$0xff]  ;;  %v140_v39 = vld [vmem:[%s277_s2] ss:$0 sm:$0xff] }
   0xe   :  { %49 = vadd.xlane.f32.xlu0 %v48_v1  ;;  %s230_s24 = smov [#allocation7]   ;;  %s119_s28 = sshll.u32 %s278_s3, 4  ;;  %s120_s28 = int_to_ptr.hbm [resolvable:$true] %s119_s28 }
   0xf   :  { %s117_s25 = sshll.u32 %s230_s24, 4  ;;  %s118_s25 = int_to_ptr.vmem [resolvable:$true] %s117_s25 }
  0x13   :  { %v142_v5 = vpop.eup %141 }
  0x14   :  { %v55_v6 = vmul.f32 32.0, %v142_v5  ;;  %vm59_vm1 = vweird.f32 %v142_v5 }
  0x16   :  { %52 = vadd.xlane.f32.xlu0 %v51_v3  ;;  %v56_v7 = vsub.f32 1.0, %v55_v6 }
  0x18   :  { %v57_v8 = vmul.f32 %v142_v5, %v56_v7 }
  0x1a   :  { %v58_v9 = vadd.f32 %v142_v5, %v57_v8 }
  0x1c   :  { %v60_v10 = vsel %vm59_vm1, %v142_v5, %v58_v9 }
  0x81   :  { %v50_v11 = vpop.xlane.xlu0 %49 }
  0x82   :  { %v61_v12 = vmul.f32 %v60_v10, %v50_v11 }
  0x84   :  { %v63_v13 = vsub.f32 %v45_v0, %v61_v12 }
  0x86   :  { %v65_v14 = vmul.f32 %v63_v13, %v63_v13 }
  0x88   :  { %v67_v15 = vsel %vm47_vm0, %v65_v14, 0.0 }
  0x89   :  { %68 = vadd.xlane.f32.xlu1 %v67_v15  ;;  %v53_v16 = vpop.xlane.xlu0 %52 }
  0x8a   :  { %v62_v17 = vmul.f32 %v60_v10, %v53_v16 }
  0x8c   :  { %v64_v18 = vsub.f32 %v46_v2, %v62_v17 }
  0x8e   :  { %v66_v19 = vmul.f32 %v64_v18, %v64_v18 }
  0x90   :  { %v70_v20 = vsel %vm47_vm0, %v66_v19, 0.0 }
  0x91   :  { %71 = vadd.xlane.f32.xlu1 %v70_v20 }
  0xfc   :  { %v69_v21 = vpop.xlane.xlu1 %68 }
  0xfd   :  { %v73_v22 = vmul.f32 %v69_v21, %v60_v10 }
  0xff   :  { %v75_v23 = vadd.f32 1e-12, %v73_v22 }
 0x101   :  { %143 = vrsqrt.f32 %v75_v23  ;;  %vm83_vm3 = vweird.f32 %v75_v23 }
 0x104   :  { %v72_v24 = vpop.xlane.xlu1 %71 }
 0x105   :  { %v74_v25 = vmul.f32 %v72_v24, %v60_v10 }
 0x107   :  { %v144_v26 = vpop.eup %143  ;;  %v76_v27 = vadd.f32 1e-12, %v74_v25 }
 0x108   :  { %v78_v28 = vmul.f32 %v144_v26, %v75_v23  ;;  %vm84_vm2 = vweird.f32 %v144_v26 }
 0x109   :  { %145 = vrsqrt.f32 %v76_v27  ;;  %vm85_vm4 = vmor %vm83_vm3, %vm84_vm2  ;;  %vm93_vm6 = vweird.f32 %v76_v27 }
 0x10a   :  { %v79_v29 = vmul.f32 %v144_v26, %v78_v28 }
 0x10c   :  { %v80_v30 = vmul.f32 0.5, %v79_v29 }
 0x10e   :  { %v81_v31 = vsub.f32 1.5, %v80_v30 }
 0x10f   :  { %v146_v32 = vpop.eup %145 }
 0x110   :  { %v82_v33 = vmul.f32 %v144_v26, %v81_v31  ;;  %v88_v34 = vmul.f32 %v146_v32, %v76_v27  ;;  %vm94_vm5 = vweird.f32 %v146_v32 }
 0x111   :  { %vm95_vm7 = vmor %vm93_vm6, %vm94_vm5 }
 0x112   :  { %v86_v36 = vsel %vm85_vm4, %v144_v26, %v82_v33  ;;  %v89_v37 = vmul.f32 %v146_v32, %v88_v34 }
 0x113   :  { %v99_v38 = vmul.f32 %v86_v36, %v63_v13 }
 0x114   :  { %v90_v40 = vmul.f32 0.5, %v89_v37 }
 0x115   :  { %v104_v41 = vmul.f32 %v139_v35, %v99_v38 }
 0x116   :  { %v91_v42 = vsub.f32 1.5, %v90_v40 }
 0x117   :  { %v109_v43 = vadd.f32 %v140_v39, %v104_v41 }
 0x118   :  { %v92_v44 = vmul.f32 %v146_v32, %v91_v42 }
 0x119   :  { %111 = vst.msk [vmem:[#allocation7] sm:$0xff] %vm47_vm0, %v109_v43 }
 0x11a   :  { %v96_v45 = vsel %vm95_vm7, %v146_v32, %v92_v44 }
 0x11b   :  { %v100_v46 = vmul.f32 %v96_v45, %v64_v18 }
 0x11d   :  { %v105_v47 = vmul.f32 %v139_v35, %v100_v46 }
 0x11f   :  { %v110_v48 = vadd.f32 %v140_v39, %v105_v47 }
 0x121   :  { %112 = vst.msk [vmem:[#allocation7 + $0x8] sm:$0xff] %vm47_vm0, %v110_v48 }
 0x122   :  { %125 = dma.vmem_to_hbm [thread:$0]  %s118_s25, 256, %s120_s28, [#allocation4], %s226_s20, %s226_s20, %s227_s21  }
 0x123   :  { %223 = dma.done.wait [#allocation4], 256  }
 0x124   :  { %224 = vsyncadd [#allocation4], 4294967040 }
 0x125   :  { %130 = vsyncpa [#allocation3], 1 }
 0x126   :  { %131 = vsyncpa [#allocation6], 1 }
 0x127   :  { %132 = vsyncpa [#allocation4], 1 }

</bundles_post_ra>
